<compile_context>
chip_gen: v6e
topology: v6e:2x2x1
jax: 0.10.0
libtpu: 0.0.40
codegen_flags: <defaults>
</compile_context>

<pallas_src>
import functools
import math

import jax
import jax.numpy as jnp
from jax.experimental import pallas as pl
from jax.experimental.pallas import tpu as pltpu


def _dice_partials_kernel(x_ref, lbl_ref, out_ref, *,
                          c, g, r, tile_m, tiles_per_split,
                          m_total, num_tiles, needs_mask):
    """Accumulates fused per-(batch,class) partial sums for one batch group.

    x_ref   : (R, TM)  float (native dtype), R = G*C rows (G batches x C classes)
    lbl_ref : (G, TM)  integer labels (native narrow dtype ok)
    out_ref : (3, R, 1) f32  -- [0]=sum(x*onehot), [1]=sum(x), [2]=sum(onehot)
    """
    t = pl.program_id(2)
    j = pl.program_id(1) * tiles_per_split + t      # global M-tile index

    @pl.when(t == 0)
    def _init():
        out_ref[...] = jnp.zeros_like(out_ref)

    # Row r of the x tile is (group gi = r // C, class ci = r % C).  With the
    # label row of group gi offset by gi*C, "label == row_iota" is exactly the
    # one-hot for that group's rows and never matches another group's rows.
    row_iota = jax.lax.broadcasted_iota(jnp.int32, (r, tile_m), 0)

    def onehot_rows(valid):
        oh = None
        for gi in range(g):                                    # static, G small
            row = lbl_ref[pl.ds(gi, 1), :].astype(jnp.int32)   # (1, TM)
            if gi:
                row = row + gi * c
            if valid is not None:
                row = jnp.where(valid, row, -1)                # -1 never matches
            eq = row == row_iota                               # (R, TM) bool
            oh = eq if oh is None else jnp.logical_or(oh, eq)
        return oh

    def accumulate(x, onehot):
        one = jnp.float32(1.0)
        zero = jnp.float32(0.0)
        out_ref[0] += jnp.sum(jnp.where(onehot, x, zero), axis=-1, keepdims=True)
        out_ref[1] += jnp.sum(x, axis=-1, keepdims=True)
        out_ref[2] += jnp.sum(jnp.where(onehot, one, zero), axis=-1, keepdims=True)

    last = num_tiles - 1
    if not needs_mask:
        accumulate(x_ref[...].astype(jnp.float32), onehot_rows(None))
    else:
        @pl.when(j < last)
        def _bulk():                                           # unmasked fast path
            accumulate(x_ref[...].astype(jnp.float32), onehot_rows(None))

        @pl.when(j == last)
        def _tail():                                           # ragged last tile
            lane = jax.lax.broadcasted_iota(jnp.int32, (1, tile_m), 1)
            valid = (last * tile_m + lane) < m_total           # (1, TM) bool
            xm = jnp.where(valid, x_ref[...].astype(jnp.float32), 0.0)
            accumulate(xm, onehot_rows(valid))


def _default_budgets():
    """Generation-aware (stream_budget, vmem_limit): v7x has 64 MiB/TC."""
    cap = 64 << 20
    try:
        info = pltpu.get_tpu_info()
        cap = int(getattr(info, "vmem_capacity_bytes", cap) or cap)
    except Exception:
        pass
    if cap <= (64 << 20):               # v7x-class: leave headroom under 64 MiB
        return 24 << 20, 48 << 20
    return 32 << 20, 64 << 20           # v5e/v6e (128 MiB; raise scoped default)


def _pick_group(n, c, x_itemsize):
    """Batch elements fused per grid step so the sublane axis (G*C) is full."""
    target = 16 if x_itemsize <= 2 else 8
    divisors = [d for d in range(1, n + 1) if n % d == 0]
    for d in divisors:
        if d * c >= target:
            return d
    return divisors[-1]


def _pick_tile_m(m, r, g, x_itemsize, lbl_itemsize, stream_budget_bytes):
    """Largest lane tile whose double-buffered input streams fit the budget."""
    per_lane = 2 * (r * x_itemsize + g * lbl_itemsize)   # x2: double buffering
    cap = stream_budget_bytes // per_lane
    cap = max(min(cap, 32768), 2048)     # >=2048 floor: v5e HBM-roofline sweet spot
    if m <= cap:
        return m                         # single tile (block == full dim is OK)
    return int(cap // 128) * 128         # must stay a multiple of 128 lanes


def dice_loss(output, target, *, epsilon=1e-5, tile_m=None, num_splits=None,
              stream_budget_bytes=None, vmem_limit_bytes=None):
    """output: (N, C, D, H, W) float; target: (N, 1, D, H, W) integer labels.

    Returns scalar float32: 1 - mean_c(dice_c), matching DiceLoss.forward.
    """
    n, c = int(output.shape[0]), int(output.shape[1])
    spatial = tuple(int(d) for d in output.shape[2:])
    assert target.shape == (n, 1) + spatial, (target.shape, output.shape)
    assert jnp.issubdtype(target.dtype, jnp.integer), "target must be integer labels"
    m = math.prod(spatial)

    sb_default, vl_default = _default_budgets()
    if stream_budget_bytes is None:
        stream_budget_bytes = sb_default
    if vmem_limit_bytes is None:
        vmem_limit_bytes = vl_default

    g = _pick_group(n, c, output.dtype.itemsize)
    r = g * c
    ng = n // g

    # Free, contiguous reshapes -- no transpose / pad / dtype-cast HBM passes.
    x = output.reshape(ng, r, m)
    lbl = target.reshape(ng, g, m)           # native (narrow) integer dtype

    if tile_m is None:
        tm = _pick_tile_m(m, r, g, output.dtype.itemsize, target.dtype.itemsize,
                          stream_budget_bytes)
    else:
        tm = int(tile_m)
        assert tm == m or tm % 128 == 0, \
            "tile_m must be a multiple of 128 (or equal D*H*W)"

    num_tiles = (m + tm - 1) // tm
    needs_mask = (m % tm) != 0

    # M-axis split: gives megacore (v7x) 2-way parallelism even when ng == 1.
    # Only used when it divides the tile count exactly (zero wasted DMA).
    if num_splits is None:
        nsplit = 2 if (num_tiles >= 2 and num_tiles % 2 == 0) else 1
    else:
        nsplit = int(num_splits)
        if nsplit < 1 or num_tiles % nsplit != 0:
            nsplit = 1
    tiles_per_split = num_tiles // nsplit

    kernel = functools.partial(
        _dice_partials_kernel, c=c, g=g, r=r, tile_m=tm,
        tiles_per_split=tiles_per_split, m_total=m,
        num_tiles=num_tiles, needs_mask=needs_mask)

    def in_map(b, s, t):
        return (b, 0, s * tiles_per_split + t)

    out = pl.pallas_call(
        kernel,
        out_shape=jax.ShapeDtypeStruct((ng * nsplit, 3, r, 1), jnp.float32),
        grid_spec=pltpu.PrefetchScalarGridSpec(
            num_scalar_prefetch=0,
            grid=(ng, nsplit, tiles_per_split),
            in_specs=[
                pl.BlockSpec((None, r, tm), in_map),
                pl.BlockSpec((None, g, tm), in_map),
            ],
            out_specs=pl.BlockSpec((None, 3, r, 1),
                                   lambda b, s, t: (b * nsplit + s, 0, 0, 0)),
        ),
        compiler_params=pltpu.CompilerParams(
            dimension_semantics=("parallel", "parallel", "arbitrary"),
            vmem_limit_bytes=int(vmem_limit_bytes),
        ),
    )(x, lbl)

    # O(N*C) finalize in plain JAX.
    parts = out[..., 0]                                        # (NG*NSPLIT, 3, R)
    sums = jnp.sum(parts, axis=0).reshape(3, g, c).sum(axis=1)  # (3, C)
    inter_c = sums[0]
    union_c = sums[1] + sums[2]
    dice = 2.0 * inter_c / jnp.maximum(union_c, epsilon)
    return (1.0 - jnp.mean(dice)).astype(jnp.float32)


def _dice_loss_ref(output, target, epsilon=1e-5):
    c = output.shape[1]
    onehot = jax.nn.one_hot(target[:, 0], c, axis=1, dtype=jnp.float32)
    xf = jnp.moveaxis(output.astype(jnp.float32), 1, 0).reshape(c, -1)
    tf = jnp.moveaxis(onehot, 1, 0).reshape(c, -1)
    inter = jnp.sum(xf * tf, axis=-1)
    union = jnp.sum(xf, axis=-1) + jnp.sum(tf, axis=-1)
    dice = 2.0 * inter / jnp.maximum(union, epsilon)
    return 1.0 - jnp.mean(dice)


if __name__ == "__main__":
    key = jax.random.PRNGKey(0)
    kx, kt = jax.random.split(key)

    N, C, D, H, W = 2, 4, 4, 15, 15        # D*H*W = 900 (ragged vs 256-lane tiles)
    output = jax.nn.softmax(
        jax.random.normal(kx, (N, C, D, H, W), dtype=jnp.float32), axis=1)
    target = jax.random.randint(kt, (N, 1, D, H, W), 0, C, dtype=jnp.int32)

    ref = jax.block_until_ready(_dice_loss_ref(output, target))

    # 1) Default path: sublane-packed (G=2 -> 8 rows), single 900-lane tile.
    loss_auto = jax.block_until_ready(dice_loss(output, target))
    assert jnp.allclose(loss_auto, ref, rtol=1e-5, atol=1e-5), (loss_auto, ref)

    # 2) Forced 256-lane tiles: 4 M-tiles -> 2-way 'parallel' M split (megacore
    #    on v7x), multi-tile accumulation, and ragged-tail masking gated to the
    #    last tile only (900 % 256 != 0).
    loss_tiled = jax.block_until_ready(dice_loss(output, target, tile_m=256))
    assert jnp.allclose(loss_tiled, ref, rtol=1e-5, atol=1e-5), (loss_tiled, ref)

    # 3) Grouping that doesn't land exactly on 8 sublanes (N=3, C=4 -> 12 rows),
    #    with tiling + masking.
    out3 = jax.nn.softmax(
        jax.random.normal(kx, (3, C, D, H, W), dtype=jnp.float32), axis=1)
    tgt3 = jax.random.randint(kt, (3, 1, D, H, W), 0, C, dtype=jnp.int32)
    ref3 = jax.block_until_ready(_dice_loss_ref(out3, tgt3))
    loss3 = jax.block_until_ready(dice_loss(out3, tgt3, tile_m=256))
    assert jnp.allclose(loss3, ref3, rtol=1e-5, atol=1e-5), (loss3, ref3)

    # 4) More than one batch group (N=4, C=4 -> G=2, NG=2): batch grid axis > 1.
    out4 = jax.nn.softmax(
        jax.random.normal(kx, (4, C, D, H, W), dtype=jnp.float32), axis=1)
    tgt4 = jax.random.randint(kt, (4, 1, D, H, W), 0, C, dtype=jnp.int32)
    ref4 = jax.block_until_ready(_dice_loss_ref(out4, tgt4))
    loss4 = jax.block_until_ready(dice_loss(out4, tgt4))
    assert jnp.allclose(loss4, ref4, rtol=1e-5, atol=1e-5), (loss4, ref4)

    print("KERNEL_OK")
</pallas_src>

<mosaic_0001>
module attributes {stable_mosaic.version = 11 : i64} {
  func.func @_dice_partials_kernel(%arg0: i32, %arg1: i32, %arg2: i32, %arg3: memref<1x8x900xf32, #tpu.memory_space<vmem>>, %arg4: memref<1x2x900xi32, #tpu.memory_space<vmem>>, %arg5: memref<1x3x8x1xf32, #tpu.memory_space<vmem>>) attributes {dimension_semantics = [#tpu.dimension_semantics<parallel>, #tpu.dimension_semantics<parallel>, #tpu.dimension_semantics<arbitrary>], iteration_bounds = array<i64: 1, 1, 1>, scalar_prefetch = 0 : i64, scratch_operands = 0 : i64, tpu.core_type = #tpu.core_type<tc>, window_params = [{transform_indices = @transform_0, window_bounds = array<i64: 1, 8, 900>}, {transform_indices = @transform_1, window_bounds = array<i64: 1, 2, 900>}, {transform_indices = @transform_2, window_bounds = array<i64: 1, 3, 8, 1>}]} {
    %c0_i32 = arith.constant 0 : i32
    %0 = arith.cmpi eq, %arg2, %c0_i32 : i32
    %1 = arith.extui %0 : i1 to i32
    %c0_i32_0 = arith.constant 0 : i32
    %2 = arith.cmpi ne, %1, %c0_i32_0 : i32
    scf.if %2 {
      %cst_36 = arith.constant 0.000000e+00 : f32
      %46 = vector.broadcast %cst_36 : f32 to vector<3x8x1xf32>
      %c0_37 = arith.constant 0 : index
      %c0_38 = arith.constant 0 : index
      %c0_39 = arith.constant 0 : index
      %c0_40 = arith.constant 0 : index
      %47 = vector.load %arg5[%c0_37, %c0_38, %c0_39, %c0_40] : memref<1x3x8x1xf32, #tpu.memory_space<vmem>>, vector<1x3x8x1xf32>
      %48 = vector.shape_cast %47 : vector<1x3x8x1xf32> to vector<3x8x1xf32>
      %49 = vector.shape_cast %46 : vector<3x8x1xf32> to vector<1x3x8x1xf32>
      tpu.vector_store %arg5[%c0_37, %c0_38, %c0_39, %c0_40], %49 {strides = array<i32>} : memref<1x3x8x1xf32, #tpu.memory_space<vmem>>, vector<1x3x8x1xf32>,
    } else {
    }
    %3 = tpu.iota {dimensions = array<i32: 0>} : vector<8x900xi32>
    %c0 = arith.constant 0 : index
    %c0_1 = arith.constant 0 : index
    %c0_2 = arith.constant 0 : index
    %4 = vector.load %arg3[%c0, %c0_1, %c0_2] : memref<1x8x900xf32, #tpu.memory_space<vmem>>, vector<1x8x900xf32>
    %5 = vector.shape_cast %4 : vector<1x8x900xf32> to vector<8x900xf32>
    %c0_3 = arith.constant 0 : index
    %c0_4 = arith.constant 0 : index
    %c0_5 = arith.constant 0 : index
    %6 = vector.load %arg4[%c0_3, %c0_4, %c0_5] : memref<1x2x900xi32, #tpu.memory_space<vmem>>, vector<1x1x900xi32>
    %7 = vector.shape_cast %6 : vector<1x1x900xi32> to vector<1x900xi32>
    %8 = vector.broadcast %7 : vector<1x900xi32> to vector<8x900xi32>
    %9 = arith.cmpi eq, %8, %3 : vector<8x900xi32>
    %c0_6 = arith.constant 0 : index
    %c1 = arith.constant 1 : index
    %c0_7 = arith.constant 0 : index
    %10 = vector.load %arg4[%c0_6, %c1, %c0_7] : memref<1x2x900xi32, #tpu.memory_space<vmem>>, vector<1x1x900xi32>
    %11 = vector.shape_cast %10 : vector<1x1x900xi32> to vector<1x900xi32>
    %c4_i32 = arith.constant 4 : i32
    %12 = vector.broadcast %c4_i32 : i32 to vector<1x900xi32>
    %13 = arith.addi %11, %12 : vector<1x900xi32>
    %14 = vector.broadcast %13 : vector<1x900xi32> to vector<8x900xi32>
    %15 = arith.cmpi eq, %14, %3 : vector<8x900xi32>
    %16 = arith.ori %9, %15 : vector<8x900xi1>
    %c0_8 = arith.constant 0 : index
    %c0_9 = arith.constant 0 : index
    %c0_10 = arith.constant 0 : index
    %c0_11 = arith.constant 0 : index
    %17 = vector.load %arg5[%c0_8, %c0_9, %c0_10, %c0_11] : memref<1x3x8x1xf32, #tpu.memory_space<vmem>>, vector<1x1x8x1xf32>
    %18 = vector.shape_cast %17 : vector<1x1x8x1xf32> to vector<8x1xf32>
    %cst = arith.constant 0.000000e+00 : f32
    %19 = vector.broadcast %cst : f32 to vector<8x900xf32>
    %20 = arith.select %16, %5, %19 : vector<8x900xi1>, vector<8x900xf32>
    %cst_12 = arith.constant dense<0.000000e+00> : vector<8xf32>
    %21 = vector.multi_reduction <add>, %20, %cst_12 [1] : vector<8x900xf32> to vector<8xf32>
    %22 = vector.shape_cast %21 : vector<8xf32> to vector<8x1xf32>
    %23 = arith.addf %18, %22 : vector<8x1xf32>
    %c0_13 = arith.constant 0 : index
    %c0_14 = arith.constant 0 : index
    %c0_15 = arith.constant 0 : index
    %c0_16 = arith.constant 0 : index
    %24 = vector.load %arg5[%c0_13, %c0_14, %c0_15, %c0_16] : memref<1x3x8x1xf32, #tpu.memory_space<vmem>>, vector<1x1x8x1xf32>
    %25 = vector.shape_cast %24 : vector<1x1x8x1xf32> to vector<8x1xf32>
    %26 = vector.shape_cast %23 : vector<8x1xf32> to vector<1x1x8x1xf32>
    tpu.vector_store %arg5[%c0_13, %c0_14, %c0_15, %c0_16], %26 {strides = array<i32>} : memref<1x3x8x1xf32, #tpu.memory_space<vmem>>, vector<1x1x8x1xf32>,
    %c0_17 = arith.constant 0 : index
    %c1_18 = arith.constant 1 : index
    %c0_19 = arith.constant 0 : index
    %c0_20 = arith.constant 0 : index
    %27 = vector.load %arg5[%c0_17, %c1_18, %c0_19, %c0_20] : memref<1x3x8x1xf32, #tpu.memory_space<vmem>>, vector<1x1x8x1xf32>
    %28 = vector.shape_cast %27 : vector<1x1x8x1xf32> to vector<8x1xf32>
    %cst_21 = arith.constant dense<0.000000e+00> : vector<8xf32>
    %29 = vector.multi_reduction <add>, %5, %cst_21 [1] : vector<8x900xf32> to vector<8xf32>
    %30 = vector.shape_cast %29 : vector<8xf32> to vector<8x1xf32>
    %31 = arith.addf %28, %30 : vector<8x1xf32>
    %c0_22 = arith.constant 0 : index
    %c1_23 = arith.constant 1 : index
    %c0_24 = arith.constant 0 : index
    %c0_25 = arith.constant 0 : index
    %32 = vector.load %arg5[%c0_22, %c1_23, %c0_24, %c0_25] : memref<1x3x8x1xf32, #tpu.memory_space<vmem>>, vector<1x1x8x1xf32>
    %33 = vector.shape_cast %32 : vector<1x1x8x1xf32> to vector<8x1xf32>
    %34 = vector.shape_cast %31 : vector<8x1xf32> to vector<1x1x8x1xf32>
    tpu.vector_store %arg5[%c0_22, %c1_23, %c0_24, %c0_25], %34 {strides = array<i32>} : memref<1x3x8x1xf32, #tpu.memory_space<vmem>>, vector<1x1x8x1xf32>,
    %c0_26 = arith.constant 0 : index
    %c2 = arith.constant 2 : index
    %c0_27 = arith.constant 0 : index
    %c0_28 = arith.constant 0 : index
    %35 = vector.load %arg5[%c0_26, %c2, %c0_27, %c0_28] : memref<1x3x8x1xf32, #tpu.memory_space<vmem>>, vector<1x1x8x1xf32>
    %36 = vector.shape_cast %35 : vector<1x1x8x1xf32> to vector<8x1xf32>
    %cst_29 = arith.constant 1.000000e+00 : f32
    %cst_30 = arith.constant 0.000000e+00 : f32
    %37 = vector.broadcast %cst_29 : f32 to vector<8x900xf32>
    %38 = vector.broadcast %cst_30 : f32 to vector<8x900xf32>
    %39 = arith.select %16, %37, %38 : vector<8x900xi1>, vector<8x900xf32>
    %cst_31 = arith.constant dense<0.000000e+00> : vector<8xf32>
    %40 = vector.multi_reduction <add>, %39, %cst_31 [1] : vector<8x900xf32> to vector<8xf32>
    %41 = vector.shape_cast %40 : vector<8xf32> to vector<8x1xf32>
    %42 = arith.addf %36, %41 : vector<8x1xf32>
    %c0_32 = arith.constant 0 : index
    %c2_33 = arith.constant 2 : index
    %c0_34 = arith.constant 0 : index
    %c0_35 = arith.constant 0 : index
    %43 = vector.load %arg5[%c0_32, %c2_33, %c0_34, %c0_35] : memref<1x3x8x1xf32, #tpu.memory_space<vmem>>, vector<1x1x8x1xf32>
    %44 = vector.shape_cast %43 : vector<1x1x8x1xf32> to vector<8x1xf32>
    %45 = vector.shape_cast %42 : vector<8x1xf32> to vector<1x1x8x1xf32>
    tpu.vector_store %arg5[%c0_32, %c2_33, %c0_34, %c0_35], %45 {strides = array<i32>} : memref<1x3x8x1xf32, #tpu.memory_space<vmem>>, vector<1x1x8x1xf32>,
    return
  }
  func.func @transform_0(%arg0: i32, %arg1: i32, %arg2: i32) -> (i32, i32, i32) {
    %c1_i32 = arith.constant 1 : i32
    %0 = arith.muli %arg1, %c1_i32 : i32
    %1 = arith.addi %0, %arg2 : i32
    %c0_i32 = arith.constant 0 : i32
    %c0_i32_0 = arith.constant 0 : i32
    return %arg0, %c0_i32, %1 : i32, i32, i32
  }
  func.func @transform_1(%arg0: i32, %arg1: i32, %arg2: i32) -> (i32, i32, i32) {
    %c1_i32 = arith.constant 1 : i32
    %0 = arith.muli %arg1, %c1_i32 : i32
    %1 = arith.addi %0, %arg2 : i32
    %c0_i32 = arith.constant 0 : i32
    %c0_i32_0 = arith.constant 0 : i32
    return %arg0, %c0_i32, %1 : i32, i32, i32
  }
  func.func @transform_2(%arg0: i32, %arg1: i32, %arg2: i32) -> (i32, i32, i32, i32) {
    %c1_i32 = arith.constant 1 : i32
    %0 = arith.muli %arg0, %c1_i32 : i32
    %1 = arith.addi %0, %arg1 : i32
    %c0_i32 = arith.constant 0 : i32
    %c0_i32_0 = arith.constant 0 : i32
    %c0_i32_1 = arith.constant 0 : i32
    %c0_i32_2 = arith.constant 0 : i32
    return %1, %c0_i32, %c0_i32_0, %c0_i32_1 : i32, i32, i32, i32
  }
}

</mosaic_0001>

<bundles_post_ra>
// kernel: tpu_custom_call.1
= control target key start
LH: loop header
LB: loop body
LE: loop exit
PB: predicated region body
PF: predicated region fallthrough
CT: control target
= control target key end

     0   :  { %7 = vsyncpa [#allocation3], 0  ;;  %s474_s0 = inlined_call_operand.hbm [shape: f32[1,8,900], index: 0, kind: input, shape index: {}]   ;;  %s475_s1 = inlined_call_operand.hbm [shape: s32[1,2,900], index: 1, kind: input, shape index: {}]   ;;  %s476_s2 = inlined_call_operand.vmem [shape: f32[1,3,8,1], index: 2, kind: output, shape index: {}]  }
   0x1   :  { %8 = vsyncpa [#allocation5], 0  ;;  %s307_s9 = smov [#allocation2]   ;;  %s308_s11 = smov [#allocation4]  }
   0x2   :  { %s19_s10 = sshll.u32 %s307_s9, 4  ;;  %s33_s12 = sshll.u32 %s308_s11, 4  ;;  %s20_s10 = int_to_ptr.vmem [resolvable:$true] %s19_s10  ;;  %s34_s12 = int_to_ptr.vmem [resolvable:$true] %s33_s12 }
   0x3   :  { %s271_s13 = scalar_lea.vmem %s20_s10, 1024  ;;  %p276_p1 = scmp.lt.s32.totalorder %s20_s10, %s20_s10 }
   0x4   :  { %p272_p0 = scmp.ne.s32.totalorder %s20_s10, %s271_s13  ;;  %p277_p2 = scmp.lt.s32.totalorder %s271_s13, %s271_s13 }
   0x6   :  { %p278_p3 = por %p277_p2, %p276_p1 }
   0x8   :  { %p279_p4 = pnand %p278_p3, %p272_p0 }
   0xa   :  { %282 = shalt.err (!%p279_p4)
}
   0xb   :  { %22 = dma.hbm_to_vmem [thread:$0]  %s474_s0, 1024, %s20_s10, [#allocation3]  }
   0xc   :  { %s291_s16 = scalar_lea.vmem %s34_s12, 256  ;;  %p296_p6 = scmp.lt.s32.totalorder %s34_s12, %s34_s12 }
   0xd   :  { %p292_p5 = scmp.ne.s32.totalorder %s34_s12, %s291_s16  ;;  %p297_p7 = scmp.lt.s32.totalorder %s291_s16, %s291_s16 }
   0xf   :  { %p298_p8 = por %p297_p7, %p296_p6 }
  0x11   :  { %p299_p9 = pnand %p298_p8, %p292_p5 }
  0x13   :  { %302 = shalt.err (!%p299_p9)
}
  0x14   :  { %36 = dma.hbm_to_vmem [thread:$0]  %s475_s1, 256, %s34_s12, [#allocation5]  }
  0x15   :  { %303 = dma.done.wait [#allocation3], 1024  }
  0x16   :  { %304 = vsyncadd [#allocation3], 4294966272 }
  0x17   :  { %305 = dma.done.wait [#allocation5], 256  }
  0x18   :  { %306 = vsyncadd [#allocation5], 4294967040  ;;  %v68_v0 = vlaneseq  ;;  %vm477_vm0 = vcmask 7168   ;;  %v309_v1 = vmov 0.0   ;;  %v78_v7 = vld [vmem:[#allocation4] ss:$2 sm:$0xff] }
  0x19   :  { %65 = vst.msk [vmem:[%s476_s2] sm:$0xff] %vm477_vm0, %v309_v1  ;;  %66 = vst.msk [vmem:[%s476_s2 + $0x8] sm:$0xff] %vm477_vm0, %v309_v1  ;;  %v70_v10 = vld [vmem:[#allocation2] sm:$0xff]  ;;  %v71_v11 = vld [vmem:[#allocation2 + $0x8] sm:$0xff] }
  0x1a   :  { %67 = vst.msk [vmem:[%s476_s2 + $0x10] sm:$0xff] %vm477_vm0, %v309_v1  ;;  %v346_v2 = vshrl.u32 %v68_v0, 7  ;;  %v120_v18 = vld [vmem:[#allocation4 + $0x1] ss:$2 sm:$0xff]  ;;  %v195_v19 = vadd.f32 %v71_v11, %v70_v10  ;;  %v72_v22 = vld [vmem:[#allocation2 + $0x10] sm:$0xff]  ;;  %v73_v34 = vld [vmem:[#allocation2 + $0x18] sm:$0xff] }
  0x1b   :  { %v121_v25 = vadd.s32 4, %v120_v18  ;;  %v74_v42 = vld [vmem:[#allocation2 + $0x20] sm:$0xff]  ;;  %v75_v52 = vld [vmem:[#allocation2 + $0x28] sm:$0xff]  ;;  %v77_v56 = vld [vmem:[#allocation2 + $0x38] sm:$0xff] }
  0x1c   :  { %v81_v3 = vsub.s32 0, %v346_v2  ;;  %v85_v4 = vsub.s32 1, %v346_v2  ;;  %v89_v5 = vsub.s32 2, %v346_v2  ;;  %v93_v6 = vsub.s32 3, %v346_v2  ;;  %v76_v60 = vld [vmem:[#allocation2 + $0x30] sm:$0xff] }
  0x1d   :  { %v97_v8 = vsub.s32 4, %v346_v2  ;;  %v101_v9 = vsub.s32 5, %v346_v2  ;;  %v105_v13 = vsub.s32 6, %v346_v2  ;;  %v109_v14 = vsub.s32 7, %v346_v2 }
  0x1e   :  { %v82_v12 = vrot.slane %v78_v7, %v81_v3  ;;  %v86_v15 = vrot.slane %v78_v7, %v85_v4  ;;  %v90_v16 = vrot.slane %v78_v7, %v89_v5  ;;  %v94_v17 = vrot.slane %v78_v7, %v93_v6 }
  0x1f   :  { %v98_v20 = vrot.slane %v78_v7, %v97_v8  ;;  %v102_v21 = vrot.slane %v78_v7, %v101_v9  ;;  %v106_v23 = vrot.slane %v78_v7, %v105_v13  ;;  %v110_v24 = vrot.slane %v78_v7, %v109_v14 }
  0x20   :  { %vm111_vm1 = vcmp.eq.s32.totalorder %v82_v12, %v346_v2  ;;  %vm112_vm2 = vcmp.eq.s32.totalorder %v86_v15, %v346_v2  ;;  %vm113_vm3 = vcmp.eq.s32.totalorder %v90_v16, %v346_v2  ;;  %vm114_vm4 = vcmp.eq.s32.totalorder %v94_v17, %v346_v2 }
  0x21   :  { %v196_v26 = vadd.f32 %v195_v19, %v72_v22  ;;  %v125_v27 = vrot.slane %v121_v25, %v81_v3  ;;  %v129_v28 = vrot.slane %v121_v25, %v85_v4  ;;  %v133_v29 = vrot.slane %v121_v25, %v89_v5 }
  0x22   :  { %v137_v30 = vrot.slane %v121_v25, %v93_v6  ;;  %vm115_vm5 = vcmp.eq.s32.totalorder %v98_v20, %v346_v2  ;;  %v141_v31 = vrot.slane %v121_v25, %v97_v8  ;;  %v145_v32 = vrot.slane %v121_v25, %v101_v9 }
  0x23   :  { %v149_v33 = vrot.slane %v121_v25, %v105_v13  ;;  %vm116_vm6 = vcmp.eq.s32.totalorder %v102_v21, %v346_v2  ;;  %vm154_vm7 = vcmp.eq.s32.totalorder %v125_v27, %v346_v2  ;;  %vm155_vm8 = vcmp.eq.s32.totalorder %v129_v28, %v346_v2  ;;  %v258_v21 = vld [vmem:[%s476_s2 + $0x10] sm:$0xff] }
  0x24   :  { %vm156_vm9 = vcmp.eq.s32.totalorder %v133_v29, %v346_v2  ;;  %v153_v35 = vrot.slane %v121_v25, %v109_v14  ;;  %vm157_vm12 = vcmp.eq.s32.totalorder %v137_v30, %v346_v2  ;;  %vm162_vm13 = vmor %vm111_vm1, %vm154_vm7  ;;  %vm158_vm14 = vcmp.eq.s32.totalorder %v141_v31, %v346_v2 }
  0x25   :  { %vm163_vm15 = vmor %vm112_vm2, %vm155_vm8  ;;  %v171_v36 = vsel %vm162_vm13, %v70_v10, 0.0  ;;  %v209_v37 = vsel %vm162_vm13, 1.0, %v309_v1  ;;  %v197_v38 = vadd.f32 %v196_v26, %v73_v34  ;;  %vm159_vm0 = vcmp.eq.s32.totalorder %v145_v32, %v346_v2  ;;  %v256_v26 = vld [vmem:[%s476_s2 + $0x8] sm:$0xff] }
  0x26   :  { %vm160_vm10 = vcmp.eq.s32.totalorder %v149_v33, %v346_v2  ;;  %vm378_vm11 = vmor %vm113_vm3, %vm156_vm9  ;;  %v172_v40 = vsel %vm163_vm15, %v71_v11, 0.0  ;;  %v210_v41 = vsel %vm163_vm15, 1.0, %v309_v1  ;;  %vm161_vm2 = vcmp.eq.s32.totalorder %v153_v35, %v346_v2 }
  0x27   :  { %vm385_vm1 = vmor %vm114_vm4, %vm157_vm12  ;;  %v173_v44 = vsel %vm378_vm11, %v72_v22, 0.0  ;;  %v179_v45 = vadd.f32 %v172_v40, %v171_v36  ;;  %v211_v46 = vsel %vm378_vm11, 1.0, %v309_v1  ;;  %v217_v47 = vadd.f32 %v210_v41, %v209_v37 }
  0x28   :  { %vm399_vm3 = vmor %vm115_vm5, %vm158_vm14  ;;  %v174_v49 = vsel %vm385_vm1, %v73_v34, 0.0  ;;  %v212_v50 = vsel %vm385_vm1, 1.0, %v309_v1  ;;  %v198_v51 = vadd.f32 %v197_v38, %v74_v42  ;;  %vm486_vm5 = vcmp.eq.s32.totalorder %v106_v23, %v346_v2 }
  0x29   :  { %vm412_vm4 = vmor %vm116_vm6, %vm159_vm0  ;;  %v180_v54 = vadd.f32 %v179_v45, %v173_v44  ;;  %v218_v55 = vadd.f32 %v217_v47, %v211_v46  ;;  %v175_v58 = vsel %vm399_vm3, %v74_v42, 0.0  ;;  %v213_v59 = vsel %vm399_vm3, 1.0, %v309_v1 }
  0x2a   :  { %vm420_vm7 = vmor %vm486_vm5, %vm160_vm10  ;;  %vm489_vm0 = vcmp.eq.s32.totalorder %v110_v24, %v346_v2  ;;  %v176_v0 = vsel %vm412_vm4, %v75_v52, 0.0  ;;  %vm185_vm8 = vcmask 31744   ;;  %v214_v3 = vsel %vm412_vm4, 1.0, %v309_v1 }
  0x2b   :  { %vm431_vm6 = vmor %vm489_vm0, %vm161_vm2  ;;  %v181_v62 = vadd.f32 %v180_v54, %v174_v49  ;;  %v219_v63 = vadd.f32 %v218_v55, %v212_v50  ;;  %v199_v4 = vadd.f32 %v198_v51, %v75_v52  ;;  %v177_v8 = vsel %vm420_vm7, %v76_v60, 0.0 }
  0x2c   :  { %v178_v5 = vsel %vm431_vm6, %v77_v56, 0.0  ;;  %v216_v2 = vsel %vm431_vm6, 1.0, %v309_v1  ;;  %v215_v9 = vsel %vm420_vm7, 1.0, %v309_v1  ;;  %v201_v17 = vsel %vm185_vm8, %v77_v56, 0.0  ;;  %v170_v1 = vld [vmem:[%s476_s2] sm:$0xff] }
  0x2d   :  { %v182_v6 = vadd.f32 %v181_v62, %v175_v58  ;;  %v220_v7 = vadd.f32 %v219_v63, %v213_v59  ;;  %v186_v12 = vsel %vm185_vm8, %v178_v5, 0.0  ;;  %v223_v13 = vsel %vm185_vm8, %v216_v2, 0.0 }
  0x2e   :  { %v200_v16 = vadd.f32 %v199_v4, %v76_v60  ;;  %vm492_vm9 = vcmask 7168  }
  0x2f   :  { %v183_v10 = vadd.f32 %v182_v6, %v176_v0  ;;  %v221_v11 = vadd.f32 %v220_v7, %v214_v3  ;;  %vm493_vm10 = vmmov %vm492_vm9 }
  0x30   :  { %v202_v20 = vadd.f32 %v201_v17, %v200_v16  ;;  %vm494_vm11 = vmmov %vm492_vm9 }
  0x31   :  { %v184_v14 = vadd.f32 %v183_v10, %v177_v8  ;;  %v222_v15 = vadd.f32 %v221_v11, %v215_v9 }
  0x33   :  { %v187_v18 = vadd.f32 %v186_v12, %v184_v14  ;;  %v224_v19 = vadd.f32 %v223_v13, %v222_v15 }
  0x35   :  { %188 = vadd.xlane.f32.xlu0 %v187_v18  ;;  %225 = vadd.xlane.f32.xlu1 %v224_v19 }
  0x39   :  { %203 = vadd.xlane.f32.xlu0 %v202_v20 }
  0xbe   :  { %v189_v22 = vpop.xlane.xlu0 %188  ;;  %v226_v23 = vpop.xlane.xlu1 %225 }
  0xbf   :  { %v190_v24 = vadd.f32 %v189_v22, %v170_v1  ;;  %v227_v25 = vadd.f32 %v258_v21, %v226_v23 }
  0xc1   :  { %192 = vst.msk [vmem:[%s476_s2] sm:$0xff] %vm492_vm9, %v190_v24 }
  0xc2   :  { %259 = vst.msk [vmem:[%s476_s2 + $0x10] sm:$0xff] %vm493_vm10, %v227_v25  ;;  %v204_v27 = vpop.xlane.xlu0 %203 }
  0xc3   :  { %v205_v28 = vadd.f32 %v256_v26, %v204_v27 }
  0xc5   :  { %257 = vst.msk [vmem:[%s476_s2 + $0x8] sm:$0xff] %vm494_vm11, %v205_v28 }
  0xc6   :  { %246 = vsyncpa [#allocation3], 1 }
  0xc7   :  { %247 = vsyncpa [#allocation5], 1 }

</bundles_post_ra>
